<compile_context>
chip_gen: v6e
topology: v6e:2x2x1
jax: 0.10.0
libtpu: 0.0.40
codegen_flags: <defaults>
</compile_context>

<pallas_src>
import functools

import jax
import jax.numpy as jnp
from jax.experimental import pallas as pl
from jax.experimental.pallas import tpu as pltpu


def crf_forward_kernel(logit_ref, etrans_ref, rowmax_ref, stop_ref, lens_ref,
                       out_ref, alpha_ref, *, t_block):
    tb = pl.program_id(1)
    n_labels = etrans_ref.shape[0]
    start_idx = n_labels - 2

    # alpha init at the first time block: -10000 everywhere, 0 at start_idx.
    @pl.when(tb == 0)
    def _init():
        col = jax.lax.broadcasted_iota(jnp.int32, alpha_ref.shape, 1)
        alpha_ref[...] = jnp.where(
            col == start_idx, jnp.float32(0.0), jnp.float32(-10000.0)
        )

    lens = lens_ref[...]          # [TB, 1] int32   (resident)
    etrans = etrans_ref[...]      # [L, L]  exp(trans - rowmax).T  (j -> i)
    rowmax = rowmax_ref[...]      # [1, L]  rowmax per destination label i
    t0 = tb * t_block

    def step(k, alpha):
        t = t0 + k
        logit = logit_ref[:, pl.ds(k, 1), :][:, 0, :]            # [TB, L]
        m_b = jnp.max(alpha, axis=1, keepdims=True)              # [TB, 1]
        s = jnp.dot(jnp.exp(alpha - m_b), etrans,
                    preferred_element_type=jnp.float32)          # [TB, L]
        alpha_next = logit + m_b + rowmax + jnp.log(s)
        # padded / finished timesteps keep the previous alpha (NaN-safe).
        return jnp.where(lens > t, alpha_next, alpha)

    alpha = jax.lax.fori_loop(
        0, t_block, step, alpha_ref[...],
        unroll=(True if t_block <= 16 else 8),
    )
    alpha_ref[...] = alpha

    # finalize at the last time block: add stop-transition row, LSE over labels.
    @pl.when(tb == pl.num_programs(1) - 1)
    def _finalize():
        a = alpha + stop_ref[...]                                 # [TB, L]
        m2 = jnp.max(a, axis=1, keepdims=True)                    # [TB, 1]
        norm = m2[:, 0] + jnp.log(jnp.sum(jnp.exp(a - m2), axis=1))   # [TB]
        out_ref[...] = norm[None, :]                              # [1, TB]


def crf_forward(logits, lens, transitions, *, t_block=128, b_block=None,
                max_len=None):
    """Pallas equivalent of CRF.forward.

    logits:      [batch, seq_len, n_labels] float32
    lens:        [batch] int
    transitions: [n_labels, n_labels] float32
    max_len:     optional static int = max(lens); trims fully-masked trailing
                 time blocks (pure grid shortening, no data copy).
    returns norm: [batch] float32
    """
    B, S, L = logits.shape
    assert transitions.shape == (L, L)
    stop_idx = L - 1

    logits = logits.astype(jnp.float32)
    transitions = transitions.astype(jnp.float32)
    lens2d = lens.astype(jnp.int32).reshape(B, 1)

    # One-time tiny (L x L) precompute for the rescaled exp-space matmul.
    rowmax = jnp.max(transitions, axis=1)                          # [L]
    etrans_t = jnp.exp(transitions - rowmax[:, None]).T            # [L(j), L(i)]
    rowmax2d = rowmax[None, :]                                     # [1, L]
    stop_row = transitions[stop_idx][None, :]                      # [1, L]

    if b_block is None:
        b_block = B
    # time block: second-to-last dim of the logits block must be a multiple of
    # 8 or equal to the full time extent.
    if t_block >= S:
        t_block = S
    else:
        t_block = max(8, (t_block // 8) * 8)

    s_eff = S if max_len is None else max(1, min(int(max_len), S))
    n_tblocks = pl.cdiv(s_eff, t_block)
    n_bblocks = pl.cdiv(B, b_block)

    blk_bytes = b_block * t_block * L * 4
    vmem_limit = int(min(100 << 20, max(32 << 20, 4 * blk_bytes)))

    kernel = functools.partial(crf_forward_kernel, t_block=t_block)

    out = pl.pallas_call(
        kernel,
        out_shape=jax.ShapeDtypeStruct((1, B), jnp.float32),
        grid_spec=pltpu.PrefetchScalarGridSpec(
            num_scalar_prefetch=0,
            grid=(n_bblocks, n_tblocks),
            in_specs=[
                pl.BlockSpec((b_block, t_block, L), lambda b, t: (b, t, 0)),  # logits
                pl.BlockSpec((L, L), lambda b, t: (0, 0)),    # exp(trans - rowmax).T
                pl.BlockSpec((1, L), lambda b, t: (0, 0)),    # rowmax
                pl.BlockSpec((1, L), lambda b, t: (0, 0)),    # stop-transition row
                pl.BlockSpec((b_block, 1), lambda b, t: (b, 0)),              # lens
            ],
            out_specs=pl.BlockSpec((1, b_block), lambda b, t: (0, b)),
            scratch_shapes=[pltpu.VMEM((b_block, L), jnp.float32)],  # alpha carry
        ),
        compiler_params=pltpu.CompilerParams(
            dimension_semantics=("parallel", "arbitrary"),
            vmem_limit_bytes=vmem_limit,
        ),
    )(logits, etrans_t, rowmax2d, stop_row, lens2d)
    return out[0]


def crf_forward_ref(logits, lens, transitions):
    """Pure-JAX reference mirroring the PyTorch loop exactly."""
    B, S, L = logits.shape
    start_idx, stop_idx = L - 2, L - 1
    alpha = jnp.full((B, L), -10000.0, jnp.float32).at[:, start_idx].set(0.0)
    for t in range(S):
        logit = logits[:, t, :]
        matrix = transitions[None] + alpha[:, None, :] + logit[:, :, None]
        m = jnp.max(matrix, axis=2)
        alpha_next = m + jnp.log(jnp.sum(jnp.exp(matrix - m[..., None]), axis=2))
        mask = (lens > t).astype(jnp.float32)[:, None]
        alpha = mask * alpha_next + (1.0 - mask) * alpha
    alpha = alpha + transitions[stop_idx][None]
    m = jnp.max(alpha, axis=1)
    return m + jnp.log(jnp.sum(jnp.exp(alpha - m[:, None]), axis=1))


if __name__ == "__main__":
    # Module config (synthetic, deterministic init; no checkpoint loading).
    vocab_size = 10
    n_labels = vocab_size + 2        # start_idx = n_labels - 2, stop_idx = n_labels - 1

    batch, seq_len = 2, 24

    key = jax.random.PRNGKey(0)
    k_trans, k_logits = jax.random.split(key)
    transitions = jax.random.normal(k_trans, (n_labels, n_labels), jnp.float32)
    logits = jax.random.normal(k_logits, (batch, seq_len, n_labels), jnp.float32)
    lens = jnp.array([16, 13], dtype=jnp.int32)

    # t_block=8 exercises the multi-time-block carry; max_len trims the fully
    # masked trailing block.
    norm = crf_forward(logits, lens, transitions,
                       t_block=8, max_len=int(jnp.max(lens)))
    norm = jax.block_until_ready(norm)

    norm_ref = crf_forward_ref(logits, lens, transitions)
    assert norm.shape == (batch,)
    assert jnp.allclose(norm, norm_ref, rtol=1e-4, atol=1e-4), (norm, norm_ref)

    # TODO(synk): viterbi_decode / transition_score are separate methods (not
    # part of forward) and are not implemented here.
    print("KERNEL_OK")
</pallas_src>

<mosaic_0001>
module attributes {stable_mosaic.version = 11 : i64} {
  func.func @crf_forward_kernel(%arg0: i32, %arg1: i32, %arg2: memref<2x8x12xf32, #tpu.memory_space<vmem>>, %arg3: memref<12x12xf32, #tpu.memory_space<vmem>>, %arg4: memref<1x12xf32, #tpu.memory_space<vmem>>, %arg5: memref<1x12xf32, #tpu.memory_space<vmem>>, %arg6: memref<2x1xi32, #tpu.memory_space<vmem>>, %arg7: memref<1x2xf32, #tpu.memory_space<vmem>>, %arg8: memref<2x12xf32, #tpu.memory_space<vmem>>) attributes {dimension_semantics = [#tpu.dimension_semantics<parallel>, #tpu.dimension_semantics<arbitrary>], iteration_bounds = array<i64: 1, 2>, scalar_prefetch = 0 : i64, scratch_operands = 1 : i64, tpu.core_type = #tpu.core_type<tc>, window_params = [{transform_indices = @transform_0, window_bounds = array<i64: 2, 8, 12>}, {pipeline_mode = #tpu.pipeline_mode<synchronous>, transform_indices = @transform_1, window_bounds = array<i64: 12, 12>}, {pipeline_mode = #tpu.pipeline_mode<synchronous>, transform_indices = @transform_2, window_bounds = array<i64: 1, 12>}, {pipeline_mode = #tpu.pipeline_mode<synchronous>, transform_indices = @transform_3, window_bounds = array<i64: 1, 12>}, {transform_indices = @transform_4, window_bounds = array<i64: 2, 1>}, {transform_indices = @transform_5, window_bounds = array<i64: 1, 2>}]} {
    %c0_i32 = arith.constant 0 : i32
    %0 = arith.cmpi eq, %arg1, %c0_i32 : i32
    %1 = arith.extui %0 : i1 to i32
    %c0_i32_0 = arith.constant 0 : i32
    %2 = arith.cmpi ne, %1, %c0_i32_0 : i32
    scf.if %2 {
      %180 = tpu.iota {dimensions = array<i32: 1>} : vector<2x12xi32>
      %c10_i32 = arith.constant 10 : i32
      %181 = vector.broadcast %c10_i32 : i32 to vector<2x12xi32>
      %182 = arith.cmpi eq, %180, %181 : vector<2x12xi32>
      %cst_45 = arith.constant 0.000000e+00 : f32
      %cst_46 = arith.constant -1.000000e+04 : f32
      %183 = vector.broadcast %cst_45 : f32 to vector<2x12xf32>
      %184 = vector.broadcast %cst_46 : f32 to vector<2x12xf32>
      %185 = arith.select %182, %183, %184 : vector<2x12xi1>, vector<2x12xf32>
      %c0_47 = arith.constant 0 : index
      %c0_48 = arith.constant 0 : index
      %186 = vector.load %arg8[%c0_47, %c0_48] : memref<2x12xf32, #tpu.memory_space<vmem>>, vector<2x12xf32>
      tpu.vector_store %arg8[%c0_47, %c0_48], %185 {strides = array<i32>} : memref<2x12xf32, #tpu.memory_space<vmem>>, vector<2x12xf32>,
    } else {
    }
    %c0 = arith.constant 0 : index
    %c0_1 = arith.constant 0 : index
    %3 = vector.load %arg6[%c0, %c0_1] : memref<2x1xi32, #tpu.memory_space<vmem>>, vector<2x1xi32>
    %c0_2 = arith.constant 0 : index
    %c0_3 = arith.constant 0 : index
    %4 = vector.load %arg3[%c0_2, %c0_3] : memref<12x12xf32, #tpu.memory_space<vmem>>, vector<12x12xf32>
    %c0_4 = arith.constant 0 : index
    %c0_5 = arith.constant 0 : index
    %5 = vector.load %arg4[%c0_4, %c0_5] : memref<1x12xf32, #tpu.memory_space<vmem>>, vector<1x12xf32>
    %c8_i32 = arith.constant 8 : i32
    %6 = arith.muli %arg1, %c8_i32 : i32
    %c0_6 = arith.constant 0 : index
    %c0_7 = arith.constant 0 : index
    %7 = vector.load %arg8[%c0_6, %c0_7] : memref<2x12xf32, #tpu.memory_space<vmem>>, vector<2x12xf32>
    %c0_i32_8 = arith.constant 0 : i32
    %8 = arith.addi %6, %c0_i32_8 : i32
    %c0_9 = arith.constant 0 : index
    %9 = arith.index_cast %c0_i32_8 : i32 to index
    %c0_10 = arith.constant 0 : index
    %10 = vector.load %arg2[%c0_9, %9, %c0_10] : memref<2x8x12xf32, #tpu.memory_space<vmem>>, vector<2x1x12xf32>
    %11 = vector.shape_cast %10 : vector<2x1x12xf32> to vector<2x12xf32>
    %cst = arith.constant dense<0xFF800000> : vector<2xf32>
    %12 = vector.multi_reduction <maximumf>, %7, %cst [1] : vector<2x12xf32> to vector<2xf32>
    %13 = vector.shape_cast %12 : vector<2xf32> to vector<2x1xf32>
    %14 = vector.broadcast %13 : vector<2x1xf32> to vector<2x12xf32>
    %15 = arith.subf %7, %14 : vector<2x12xf32>
    %16 = math.exp %15 : vector<2x12xf32>
    %cst_11 = arith.constant dense<0.000000e+00> : vector<2x12xf32>
    %17 = tpu.matmul %16, %4, %cst_11 {dimension_numbers = #tpu.dot_dimension_numbers<[1], [0], [0], [1], [0, 0, 1, 1], [], []>} : vector<2x12xf32>, vector<12x12xf32>, vector<2x12xf32> -> vector<2x12xf32>
    %18 = vector.broadcast %13 : vector<2x1xf32> to vector<2x12xf32>
    %19 = arith.addf %11, %18 : vector<2x12xf32>
    %20 = vector.broadcast %5 : vector<1x12xf32> to vector<2x12xf32>
    %21 = arith.addf %19, %20 : vector<2x12xf32>
    %22 = math.log %17 : vector<2x12xf32>
    %23 = arith.addf %21, %22 : vector<2x12xf32>
    %24 = vector.broadcast %8 : i32 to vector<2x1xi32>
    %25 = arith.cmpi sgt, %3, %24 : vector<2x1xi32>
    %26 = vector.shape_cast %25 : vector<2x1xi1> to vector<2x1xi1>
    %27 = vector.broadcast %26 : vector<2x1xi1> to vector<2x12xi1>
    %28 = arith.select %27, %23, %7 : vector<2x12xi1>, vector<2x12xf32>
    %c1_i32 = arith.constant 1 : i32
    %29 = arith.addi %6, %c1_i32 : i32
    %c0_12 = arith.constant 0 : index
    %30 = arith.index_cast %c1_i32 : i32 to index
    %c0_13 = arith.constant 0 : index
    %31 = vector.load %arg2[%c0_12, %30, %c0_13] : memref<2x8x12xf32, #tpu.memory_space<vmem>>, vector<2x1x12xf32>
    %32 = vector.shape_cast %31 : vector<2x1x12xf32> to vector<2x12xf32>
    %cst_14 = arith.constant dense<0xFF800000> : vector<2xf32>
    %33 = vector.multi_reduction <maximumf>, %28, %cst_14 [1] : vector<2x12xf32> to vector<2xf32>
    %34 = vector.shape_cast %33 : vector<2xf32> to vector<2x1xf32>
    %35 = vector.broadcast %34 : vector<2x1xf32> to vector<2x12xf32>
    %36 = arith.subf %28, %35 : vector<2x12xf32>
    %37 = math.exp %36 : vector<2x12xf32>
    %cst_15 = arith.constant dense<0.000000e+00> : vector<2x12xf32>
    %38 = tpu.matmul %37, %4, %cst_15 {dimension_numbers = #tpu.dot_dimension_numbers<[1], [0], [0], [1], [0, 0, 1, 1], [], []>} : vector<2x12xf32>, vector<12x12xf32>, vector<2x12xf32> -> vector<2x12xf32>
    %39 = vector.broadcast %34 : vector<2x1xf32> to vector<2x12xf32>
    %40 = arith.addf %32, %39 : vector<2x12xf32>
    %41 = vector.broadcast %5 : vector<1x12xf32> to vector<2x12xf32>
    %42 = arith.addf %40, %41 : vector<2x12xf32>
    %43 = math.log %38 : vector<2x12xf32>
    %44 = arith.addf %42, %43 : vector<2x12xf32>
    %45 = vector.broadcast %29 : i32 to vector<2x1xi32>
    %46 = arith.cmpi sgt, %3, %45 : vector<2x1xi32>
    %47 = vector.shape_cast %46 : vector<2x1xi1> to vector<2x1xi1>
    %48 = vector.broadcast %47 : vector<2x1xi1> to vector<2x12xi1>
    %49 = arith.select %48, %44, %28 : vector<2x12xi1>, vector<2x12xf32>
    %c2_i32 = arith.constant 2 : i32
    %50 = arith.addi %6, %c2_i32 : i32
    %c0_16 = arith.constant 0 : index
    %51 = arith.index_cast %c2_i32 : i32 to index
    %c0_17 = arith.constant 0 : index
    %52 = vector.load %arg2[%c0_16, %51, %c0_17] : memref<2x8x12xf32, #tpu.memory_space<vmem>>, vector<2x1x12xf32>
    %53 = vector.shape_cast %52 : vector<2x1x12xf32> to vector<2x12xf32>
    %cst_18 = arith.constant dense<0xFF800000> : vector<2xf32>
    %54 = vector.multi_reduction <maximumf>, %49, %cst_18 [1] : vector<2x12xf32> to vector<2xf32>
    %55 = vector.shape_cast %54 : vector<2xf32> to vector<2x1xf32>
    %56 = vector.broadcast %55 : vector<2x1xf32> to vector<2x12xf32>
    %57 = arith.subf %49, %56 : vector<2x12xf32>
    %58 = math.exp %57 : vector<2x12xf32>
    %cst_19 = arith.constant dense<0.000000e+00> : vector<2x12xf32>
    %59 = tpu.matmul %58, %4, %cst_19 {dimension_numbers = #tpu.dot_dimension_numbers<[1], [0], [0], [1], [0, 0, 1, 1], [], []>} : vector<2x12xf32>, vector<12x12xf32>, vector<2x12xf32> -> vector<2x12xf32>
    %60 = vector.broadcast %55 : vector<2x1xf32> to vector<2x12xf32>
    %61 = arith.addf %53, %60 : vector<2x12xf32>
    %62 = vector.broadcast %5 : vector<1x12xf32> to vector<2x12xf32>
    %63 = arith.addf %61, %62 : vector<2x12xf32>
    %64 = math.log %59 : vector<2x12xf32>
    %65 = arith.addf %63, %64 : vector<2x12xf32>
    %66 = vector.broadcast %50 : i32 to vector<2x1xi32>
    %67 = arith.cmpi sgt, %3, %66 : vector<2x1xi32>
    %68 = vector.shape_cast %67 : vector<2x1xi1> to vector<2x1xi1>
    %69 = vector.broadcast %68 : vector<2x1xi1> to vector<2x12xi1>
    %70 = arith.select %69, %65, %49 : vector<2x12xi1>, vector<2x12xf32>
    %c3_i32 = arith.constant 3 : i32
    %71 = arith.addi %6, %c3_i32 : i32
    %c0_20 = arith.constant 0 : index
    %72 = arith.index_cast %c3_i32 : i32 to index
    %c0_21 = arith.constant 0 : index
    %73 = vector.load %arg2[%c0_20, %72, %c0_21] : memref<2x8x12xf32, #tpu.memory_space<vmem>>, vector<2x1x12xf32>
    %74 = vector.shape_cast %73 : vector<2x1x12xf32> to vector<2x12xf32>
    %cst_22 = arith.constant dense<0xFF800000> : vector<2xf32>
    %75 = vector.multi_reduction <maximumf>, %70, %cst_22 [1] : vector<2x12xf32> to vector<2xf32>
    %76 = vector.shape_cast %75 : vector<2xf32> to vector<2x1xf32>
    %77 = vector.broadcast %76 : vector<2x1xf32> to vector<2x12xf32>
    %78 = arith.subf %70, %77 : vector<2x12xf32>
    %79 = math.exp %78 : vector<2x12xf32>
    %cst_23 = arith.constant dense<0.000000e+00> : vector<2x12xf32>
    %80 = tpu.matmul %79, %4, %cst_23 {dimension_numbers = #tpu.dot_dimension_numbers<[1], [0], [0], [1], [0, 0, 1, 1], [], []>} : vector<2x12xf32>, vector<12x12xf32>, vector<2x12xf32> -> vector<2x12xf32>
    %81 = vector.broadcast %76 : vector<2x1xf32> to vector<2x12xf32>
    %82 = arith.addf %74, %81 : vector<2x12xf32>
    %83 = vector.broadcast %5 : vector<1x12xf32> to vector<2x12xf32>
    %84 = arith.addf %82, %83 : vector<2x12xf32>
    %85 = math.log %80 : vector<2x12xf32>
    %86 = arith.addf %84, %85 : vector<2x12xf32>
    %87 = vector.broadcast %71 : i32 to vector<2x1xi32>
    %88 = arith.cmpi sgt, %3, %87 : vector<2x1xi32>
    %89 = vector.shape_cast %88 : vector<2x1xi1> to vector<2x1xi1>
    %90 = vector.broadcast %89 : vector<2x1xi1> to vector<2x12xi1>
    %91 = arith.select %90, %86, %70 : vector<2x12xi1>, vector<2x12xf32>
    %c4_i32 = arith.constant 4 : i32
    %92 = arith.addi %6, %c4_i32 : i32
    %c0_24 = arith.constant 0 : index
    %93 = arith.index_cast %c4_i32 : i32 to index
    %c0_25 = arith.constant 0 : index
    %94 = vector.load %arg2[%c0_24, %93, %c0_25] : memref<2x8x12xf32, #tpu.memory_space<vmem>>, vector<2x1x12xf32>
    %95 = vector.shape_cast %94 : vector<2x1x12xf32> to vector<2x12xf32>
    %cst_26 = arith.constant dense<0xFF800000> : vector<2xf32>
    %96 = vector.multi_reduction <maximumf>, %91, %cst_26 [1] : vector<2x12xf32> to vector<2xf32>
    %97 = vector.shape_cast %96 : vector<2xf32> to vector<2x1xf32>
    %98 = vector.broadcast %97 : vector<2x1xf32> to vector<2x12xf32>
    %99 = arith.subf %91, %98 : vector<2x12xf32>
    %100 = math.exp %99 : vector<2x12xf32>
    %cst_27 = arith.constant dense<0.000000e+00> : vector<2x12xf32>
    %101 = tpu.matmul %100, %4, %cst_27 {dimension_numbers = #tpu.dot_dimension_numbers<[1], [0], [0], [1], [0, 0, 1, 1], [], []>} : vector<2x12xf32>, vector<12x12xf32>, vector<2x12xf32> -> vector<2x12xf32>
    %102 = vector.broadcast %97 : vector<2x1xf32> to vector<2x12xf32>
    %103 = arith.addf %95, %102 : vector<2x12xf32>
    %104 = vector.broadcast %5 : vector<1x12xf32> to vector<2x12xf32>
    %105 = arith.addf %103, %104 : vector<2x12xf32>
    %106 = math.log %101 : vector<2x12xf32>
    %107 = arith.addf %105, %106 : vector<2x12xf32>
    %108 = vector.broadcast %92 : i32 to vector<2x1xi32>
    %109 = arith.cmpi sgt, %3, %108 : vector<2x1xi32>
    %110 = vector.shape_cast %109 : vector<2x1xi1> to vector<2x1xi1>
    %111 = vector.broadcast %110 : vector<2x1xi1> to vector<2x12xi1>
    %112 = arith.select %111, %107, %91 : vector<2x12xi1>, vector<2x12xf32>
    %c5_i32 = arith.constant 5 : i32
    %113 = arith.addi %6, %c5_i32 : i32
    %c0_28 = arith.constant 0 : index
    %114 = arith.index_cast %c5_i32 : i32 to index
    %c0_29 = arith.constant 0 : index
    %115 = vector.load %arg2[%c0_28, %114, %c0_29] : memref<2x8x12xf32, #tpu.memory_space<vmem>>, vector<2x1x12xf32>
    %116 = vector.shape_cast %115 : vector<2x1x12xf32> to vector<2x12xf32>
    %cst_30 = arith.constant dense<0xFF800000> : vector<2xf32>
    %117 = vector.multi_reduction <maximumf>, %112, %cst_30 [1] : vector<2x12xf32> to vector<2xf32>
    %118 = vector.shape_cast %117 : vector<2xf32> to vector<2x1xf32>
    %119 = vector.broadcast %118 : vector<2x1xf32> to vector<2x12xf32>
    %120 = arith.subf %112, %119 : vector<2x12xf32>
    %121 = math.exp %120 : vector<2x12xf32>
    %cst_31 = arith.constant dense<0.000000e+00> : vector<2x12xf32>
    %122 = tpu.matmul %121, %4, %cst_31 {dimension_numbers = #tpu.dot_dimension_numbers<[1], [0], [0], [1], [0, 0, 1, 1], [], []>} : vector<2x12xf32>, vector<12x12xf32>, vector<2x12xf32> -> vector<2x12xf32>
    %123 = vector.broadcast %118 : vector<2x1xf32> to vector<2x12xf32>
    %124 = arith.addf %116, %123 : vector<2x12xf32>
    %125 = vector.broadcast %5 : vector<1x12xf32> to vector<2x12xf32>
    %126 = arith.addf %124, %125 : vector<2x12xf32>
    %127 = math.log %122 : vector<2x12xf32>
    %128 = arith.addf %126, %127 : vector<2x12xf32>
    %129 = vector.broadcast %113 : i32 to vector<2x1xi32>
    %130 = arith.cmpi sgt, %3, %129 : vector<2x1xi32>
    %131 = vector.shape_cast %130 : vector<2x1xi1> to vector<2x1xi1>
    %132 = vector.broadcast %131 : vector<2x1xi1> to vector<2x12xi1>
    %133 = arith.select %132, %128, %112 : vector<2x12xi1>, vector<2x12xf32>
    %c6_i32 = arith.constant 6 : i32
    %134 = arith.addi %6, %c6_i32 : i32
    %c0_32 = arith.constant 0 : index
    %135 = arith.index_cast %c6_i32 : i32 to index
    %c0_33 = arith.constant 0 : index
    %136 = vector.load %arg2[%c0_32, %135, %c0_33] : memref<2x8x12xf32, #tpu.memory_space<vmem>>, vector<2x1x12xf32>
    %137 = vector.shape_cast %136 : vector<2x1x12xf32> to vector<2x12xf32>
    %cst_34 = arith.constant dense<0xFF800000> : vector<2xf32>
    %138 = vector.multi_reduction <maximumf>, %133, %cst_34 [1] : vector<2x12xf32> to vector<2xf32>
    %139 = vector.shape_cast %138 : vector<2xf32> to vector<2x1xf32>
    %140 = vector.broadcast %139 : vector<2x1xf32> to vector<2x12xf32>
    %141 = arith.subf %133, %140 : vector<2x12xf32>
    %142 = math.exp %141 : vector<2x12xf32>
    %cst_35 = arith.constant dense<0.000000e+00> : vector<2x12xf32>
    %143 = tpu.matmul %142, %4, %cst_35 {dimension_numbers = #tpu.dot_dimension_numbers<[1], [0], [0], [1], [0, 0, 1, 1], [], []>} : vector<2x12xf32>, vector<12x12xf32>, vector<2x12xf32> -> vector<2x12xf32>
    %144 = vector.broadcast %139 : vector<2x1xf32> to vector<2x12xf32>
    %145 = arith.addf %137, %144 : vector<2x12xf32>
    %146 = vector.broadcast %5 : vector<1x12xf32> to vector<2x12xf32>
    %147 = arith.addf %145, %146 : vector<2x12xf32>
    %148 = math.log %143 : vector<2x12xf32>
    %149 = arith.addf %147, %148 : vector<2x12xf32>
    %150 = vector.broadcast %134 : i32 to vector<2x1xi32>
    %151 = arith.cmpi sgt, %3, %150 : vector<2x1xi32>
    %152 = vector.shape_cast %151 : vector<2x1xi1> to vector<2x1xi1>
    %153 = vector.broadcast %152 : vector<2x1xi1> to vector<2x12xi1>
    %154 = arith.select %153, %149, %133 : vector<2x12xi1>, vector<2x12xf32>
    %c7_i32 = arith.constant 7 : i32
    %155 = arith.addi %6, %c7_i32 : i32
    %c0_36 = arith.constant 0 : index
    %156 = arith.index_cast %c7_i32 : i32 to index
    %c0_37 = arith.constant 0 : index
    %157 = vector.load %arg2[%c0_36, %156, %c0_37] : memref<2x8x12xf32, #tpu.memory_space<vmem>>, vector<2x1x12xf32>
    %158 = vector.shape_cast %157 : vector<2x1x12xf32> to vector<2x12xf32>
    %cst_38 = arith.constant dense<0xFF800000> : vector<2xf32>
    %159 = vector.multi_reduction <maximumf>, %154, %cst_38 [1] : vector<2x12xf32> to vector<2xf32>
    %160 = vector.shape_cast %159 : vector<2xf32> to vector<2x1xf32>
    %161 = vector.broadcast %160 : vector<2x1xf32> to vector<2x12xf32>
    %162 = arith.subf %154, %161 : vector<2x12xf32>
    %163 = math.exp %162 : vector<2x12xf32>
    %cst_39 = arith.constant dense<0.000000e+00> : vector<2x12xf32>
    %164 = tpu.matmul %163, %4, %cst_39 {dimension_numbers = #tpu.dot_dimension_numbers<[1], [0], [0], [1], [0, 0, 1, 1], [], []>} : vector<2x12xf32>, vector<12x12xf32>, vector<2x12xf32> -> vector<2x12xf32>
    %165 = vector.broadcast %160 : vector<2x1xf32> to vector<2x12xf32>
    %166 = arith.addf %158, %165 : vector<2x12xf32>
    %167 = vector.broadcast %5 : vector<1x12xf32> to vector<2x12xf32>
    %168 = arith.addf %166, %167 : vector<2x12xf32>
    %169 = math.log %164 : vector<2x12xf32>
    %170 = arith.addf %168, %169 : vector<2x12xf32>
    %171 = vector.broadcast %155 : i32 to vector<2x1xi32>
    %172 = arith.cmpi sgt, %3, %171 : vector<2x1xi32>
    %173 = vector.shape_cast %172 : vector<2x1xi1> to vector<2x1xi1>
    %174 = vector.broadcast %173 : vector<2x1xi1> to vector<2x12xi1>
    %175 = arith.select %174, %170, %154 : vector<2x12xi1>, vector<2x12xf32>
    %c8_i32_40 = arith.constant 8 : i32
    %c0_41 = arith.constant 0 : index
    %c0_42 = arith.constant 0 : index
    %176 = vector.load %arg8[%c0_41, %c0_42] : memref<2x12xf32, #tpu.memory_space<vmem>>, vector<2x12xf32>
    tpu.vector_store %arg8[%c0_41, %c0_42], %175 {strides = array<i32>} : memref<2x12xf32, #tpu.memory_space<vmem>>, vector<2x12xf32>,
    %c1_i32_43 = arith.constant 1 : i32
    %177 = arith.cmpi eq, %arg1, %c1_i32_43 : i32
    %178 = arith.extui %177 : i1 to i32
    %c0_i32_44 = arith.constant 0 : i32
    %179 = arith.cmpi ne, %178, %c0_i32_44 : i32
    scf.if %179 {
      %c0_45 = arith.constant 0 : index
      %c0_46 = arith.constant 0 : index
      %180 = vector.load %arg5[%c0_45, %c0_46] : memref<1x12xf32, #tpu.memory_space<vmem>>, vector<1x12xf32>
      %181 = vector.broadcast %180 : vector<1x12xf32> to vector<2x12xf32>
      %182 = arith.addf %175, %181 : vector<2x12xf32>
      %cst_47 = arith.constant dense<0xFF800000> : vector<2xf32>
      %183 = vector.multi_reduction <maximumf>, %182, %cst_47 [1] : vector<2x12xf32> to vector<2xf32>
      %184 = vector.shape_cast %183 : vector<2xf32> to vector<2x1xf32>
      %185 = vector.shape_cast %184 : vector<2x1xf32> to vector<2xf32>
      %186 = vector.broadcast %184 : vector<2x1xf32> to vector<2x12xf32>
      %187 = arith.subf %182, %186 : vector<2x12xf32>
      %188 = math.exp %187 : vector<2x12xf32>
      %cst_48 = arith.constant dense<0.000000e+00> : vector<2xf32>
      %189 = vector.multi_reduction <add>, %188, %cst_48 [1] : vector<2x12xf32> to vector<2xf32>
      %190 = math.log %189 : vector<2xf32>
      %191 = arith.addf %185, %190 : vector<2xf32>
      %192 = vector.shape_cast %191 : vector<2xf32> to vector<1x2xf32>
      %c0_49 = arith.constant 0 : index
      %c0_50 = arith.constant 0 : index
      %193 = vector.load %arg7[%c0_49, %c0_50] : memref<1x2xf32, #tpu.memory_space<vmem>>, vector<1x2xf32>
      tpu.vector_store %arg7[%c0_49, %c0_50], %192 {strides = array<i32>} : memref<1x2xf32, #tpu.memory_space<vmem>>, vector<1x2xf32>,
    } else {
    }
    return
  }
  func.func @transform_0(%arg0: i32, %arg1: i32) -> (i32, i32, i32) {
    %c0_i32 = arith.constant 0 : i32
    %c0_i32_0 = arith.constant 0 : i32
    return %arg0, %arg1, %c0_i32 : i32, i32, i32
  }
  func.func @transform_1(%arg0: i32, %arg1: i32) -> (i32, i32) {
    %c0_i32 = arith.constant 0 : i32
    %c0_i32_0 = arith.constant 0 : i32
    %c0_i32_1 = arith.constant 0 : i32
    return %c0_i32, %c0_i32_0 : i32, i32
  }
  func.func @transform_2(%arg0: i32, %arg1: i32) -> (i32, i32) {
    %c0_i32 = arith.constant 0 : i32
    %c0_i32_0 = arith.constant 0 : i32
    %c0_i32_1 = arith.constant 0 : i32
    return %c0_i32, %c0_i32_0 : i32, i32
  }
  func.func @transform_3(%arg0: i32, %arg1: i32) -> (i32, i32) {
    %c0_i32 = arith.constant 0 : i32
    %c0_i32_0 = arith.constant 0 : i32
    %c0_i32_1 = arith.constant 0 : i32
    return %c0_i32, %c0_i32_0 : i32, i32
  }
  func.func @transform_4(%arg0: i32, %arg1: i32) -> (i32, i32) {
    %c0_i32 = arith.constant 0 : i32
    %c0_i32_0 = arith.constant 0 : i32
    return %arg0, %c0_i32 : i32, i32
  }
  func.func @transform_5(%arg0: i32, %arg1: i32) -> (i32, i32) {
    %c0_i32 = arith.constant 0 : i32
    %c0_i32_0 = arith.constant 0 : i32
    return %c0_i32, %arg0 : i32, i32
  }
}

</mosaic_0001>

<bundles_post_ra>
// kernel: tpu_custom_call.1
= control target key start
LH: loop header
LB: loop body
LE: loop exit
PB: predicated region body
PF: predicated region fallthrough
CT: control target
= control target key end

     0   :  { %10 = vsyncpa [#allocation5], 0  ;;  %s1628_s18 = smov 0   ;;  %s1630_s19 = smov 0   ;;  %s1883_s0 = inlined_call_operand.vmem [shape: f32[2,24,12], index: 0, kind: input, shape index: {}]   ;;  %s1884_s1 = inlined_call_operand.vmem [shape: f32[12,12], index: 1, kind: input, shape index: {}]   ;;  %s1885_s2 = inlined_call_operand.vmem [shape: f32[1,12], index: 2, kind: input, shape index: {}]   ;;  %s1886_s3 = inlined_call_operand.vmem [shape: f32[1,12], index: 3, kind: input, shape index: {}]   ;;  %s1887_s4 = inlined_call_operand.vmem [shape: s32[2,1], index: 4, kind: input, shape index: {}]   ;;  %s1888_s5 = inlined_call_operand.hbm [shape: f32[1,2], index: 5, kind: output, shape index: {}]  }
   0x1   :  { %s1632_s20 = smov 0   ;;  %s1634_s21 = smov 0  }
   0x2   :  { %s1636_s22 = smov 0  }
   0x3 LB: > { %s1323_s23 = sadd.s32 4294967295, %s1591_s22   ;;  %s25_s24 = sadd.s32 1, %s1587_s21  ;;  %s1591_s22 = sphi %s1636_s22, %s16_s22   ;;  %s1587_s21 = sphi %s1634_s21, %s1893_s21   ;;  %s1583_s20 = sphi %s1632_s20, %s1892_s20   ;;  %s1579_s19 = sphi %s1630_s19, %s1891_s19   ;;  %s1575_s18 = sphi %s1628_s18, %s1890_s18  }
   0x4   : > { %p26_p0 = scmp.ge.s32.totalorder %s25_s24, 2  ;;  %p44_p1 = scmp.ne.s32.totalorder %s1579_s19, %s1575_s18 }
   0x5   : > { %p45_p2 = scmp.eq.s32.totalorder %s1591_s22, 0  ;;  %s37_s26 = sadd.s32 1, %s1579_s19 }
   0x6   : > { %s1895_s24 = smov (%p26_p0, %s25_s24), 0  ;;  %p1326_p5 = scmp.ge.s32.totalorder %s1591_s22, 2 }
   0x7   : > { %p46_p3 = por %p45_p2, %p44_p1  ;;  %s33_s25 = ssub.s32 %s1587_s21, %s1895_s24 }
   0x8   : > { %p35_p4 = scmp.eq.s32.totalorder %s33_s25, 0  ;;  %201 = sbr.rel (%p1326_p5) target bundleno = 18 (0x12), region = 32 }
   0xa   : > { %s1664_s27 = scalar_select %p35_p4, %s1579_s19, %s37_s26  }
   0xd   : > { %204 = sbr.rel (!%p46_p3) target bundleno = 18 (0x12), region = 36  ;;  %s206_s28 = sand.u32 (%p46_p3), 1, %s1579_s19  }
   0xe   : > { %s1328_s29 = sshll.u32 (%p46_p3), %s1587_s21, 3  ;;  %s1327_s30 = sshll.u32 (%p46_p3), %s206_s28, 4 }
   0xf   : > { %s213_s8 = scalar_lea.vmem (%p46_p3), %s1883_s0, %s1328_s29  ;;  %s208_s9 = scalar_lea.vmem (%p46_p3), [#allocation3], %s1327_s30 }
  0x10   : > { %v244_v0 = vld [vmem:[%s213_s8] sm:$0xff] (%p46_p3)  ;;  %v246_v1 = vld [vmem:[%s213_s8 + $0x18] sm:$0xff] (%p46_p3) }
  0x11   : > { %245 = vst [vmem:[%s208_s9] sm:$0xff] (%p46_p3), %v244_v0  ;;  %247 = vst [vmem:[%s208_s9 + $0x8] sm:$0xff] (%p46_p3), %v246_v1 }
  0x12 PF: > { %p1329_p6 = scmp.ge.s32.totalorder %s1591_s22, 1  ;;  %p252_p7 = scmp.lt.s32.totalorder %s1591_s22, 3 }
  0x14   : > { %p253_p8 = pnand %p1329_p6, %p252_p7 }
  0x15   : > { %s259_s10 = sand.u32 (!%p253_p8), 1, %s1575_s18   ;;  %p1331_p9 = scmp.ne.s32.totalorder (!%p253_p8), %s1583_s20, 0 }
  0x16   : > { %256 = sbr.rel (%p253_p8) target bundleno = 3374 (0xd2e), region = 74  ;;  %s1330_s11 = sshll.u32 (!%p253_p8), %s259_s10, 4 }
  0x17   : > { %s1675_s12 = scalar_lea.vmem (!%p253_p8), [#allocation3], %s1330_s11 }
  0x1b   : > { %293 = sbr.rel (%p1331_p9) target bundleno = 39 (0x27), region = 82 }
  0x20   : > { %v294_v2 = vlaneseq  ;;  %vm298_vm0 = vcmask 91136   ;;  %v1593_v4 = vmov -10000.0  }
  0x22   : > { %v295_v3 = vand.u32 127, %v294_v2 }
  0x24   : > { %vm296_vm1 = vcmp.eq.s32.totalorder %v295_v3, 10 }
  0x25   : > { %v297_v5 = vsel %vm296_vm1, 0.0, %v1593_v4 }
  0x26   : > { %299 = vst.msk [vmem:[#allocation2] sm:$0x3] %vm298_vm0, %v297_v5 }
  0x27 PF: > { %vm308_vm2 = vcmask 91136   ;;  %v1685_v8 = vld [vmem:[%s1884_s1 + $0x8] sm:$0xf]  ;;  %vm319_vm3 = vcmask 1043456   ;;  %v1594_v9 = vmov 0.0   ;;  %v1691_v10 = vld [vmem:[%s1884_s1] sm:$0xff] }
  0x28   : > { %1380 = vmatprep.subr.mxu0 %v1594_v9  ;;  %vm1595_vm4 = vmmov 0   ;;  %1387 = vmatprep.subr.mxu1 %v1594_v9  ;;  %v1711_v11 = vld [vmem:[%s1887_s4] sm:$0x3]  ;;  %s1714_s25 = sshll.u32 %s1583_s20, 3  ;;  %v1596_v12 = vmov 0   ;;  %vm315_vm7 = vcmask 97280  }
  0x29   : > { %1384 = vmatprep.mubr.msk.f32.mxu0 %vm1595_vm4, %v1594_v9  ;;  %1381 = vmatpush3.msk.msra.mxu0 %vm319_vm3, %v1685_v8  ;;  %v415_v13 = vstv %s1714_s25  ;;  %s540_s26 = sadd.s32 2, %s1714_s25  ;;  %v307_v24 = vld [vmem:[%s1675_s12 + $0x8] sm:$0x1]  ;;  %v306_v25 = vld [vmem:[%s1675_s12] sm:$0x1]  ;;  %vm425_vm8 = vcmask 1041409  }
  0x2a   : > { %1382 = vmatprep.subr.mxu0 %v1594_v9  ;;  %1388 = vmatpush3.msk.msra.mxu1 %vm319_vm3, %v1685_v8  ;;  %vm416_vm5 = vcmp.gt.s32.totalorder %v1711_v11, %v415_v13  ;;  %v638_v14 = vstv %s540_s26  ;;  %v1738_v30 = vld [vmem:[%s1885_s2] ss:$0 sm:$0xff]  ;;  %s429_s30 = sadd.s32 1, %s1714_s25  ;;  %v431_v50 = vld [vmem:[%s1675_s12 + $0x9] sm:$0x1]  ;;  %s651_s6 = sadd.s32 3, %s1714_s25 }
  0x2b   : > { %1383 = vmatpush3.msra.mxu0 %v1691_v10  ;;  %1389 = vmatprep.subr.mxu1 %v1594_v9  ;;  %v417_v15 = vsel %vm416_vm5, 1, %v1596_v12  ;;  %vm639_vm6 = vcmp.gt.s32.totalorder %v1711_v11, %v638_v14  ;;  %v527_v41 = vstv %s429_s30  ;;  %v430_v51 = vld [vmem:[%s1675_s12 + $0x1] sm:$0x1]  ;;  %v749_v2 = vstv %s651_s6  ;;  %s762_s7 = sadd.s32 4, %s1714_s25  ;;  %s873_s8 = sadd.s32 5, %s1714_s25 }
  0x2c   : > { %1390 = vmatpush3.msra.mxu1 %v1691_v10  ;;  %1391 = vmatprep.mubr.msk.f32.mxu1 %vm1595_vm4, %v1594_v9  ;;  %v640_v16 = vsel %vm639_vm6, 1, %v1596_v12  ;;  %vm528_vm10 = vcmp.gt.s32.totalorder %v1711_v11, %v527_v41  ;;  %vm750_vm12 = vcmp.gt.s32.totalorder %v1711_v11, %v749_v2  ;;  %s984_s9 = sadd.s32 6, %s1714_s25  ;;  %s1095_s10 = sadd.s32 7, %s1714_s25 }
  0x2d   : > { %v1678_v6 = vld [vmem:[#allocation2] sm:$0x3]  ;;  %1394 = vmatprep.subr.mxu0 %v1594_v9  ;;  %1401 = vmatprep.subr.mxu1 %v1594_v9  ;;  %v529_v42 = vsel %vm528_vm10, 1, %v1596_v12  ;;  %v751_v3 = vsel %vm750_vm12, 1, %v1596_v12  ;;  %p1350_p10 = scmp.ne.s32.totalorder %s1583_s20, 1 }
  0x2e   : > { %v309_v7 = vsel %vm308_vm2, %v1678_v6, -inf  ;;  %1487 = vset.pattern.permute.xlu0 %v1596_v12  ;;  %1488 = vset.pattern.permute.xlu1 %v1596_v12 }
  0x2f   : > { %310 = vmax.xlane.f32.xlu0 %v309_v7 }
  0x45   : > { %419 = vperm.xlu0 %1487, %v417_v15  }
  0x49   : > { %642 = vperm.xlu0 %1487, %v640_v16   ;;  %v542_v16 = vld [vmem:[%s1675_s12 + $0xa] sm:$0x1] }
  0xb8   : > { %v311_v17 = vpop.xlane.xlu0 %310 }
  0xb9   : > { %v312_v18 = vsub.f32 %v1678_v6, %v311_v17  ;;  %v394_v23 = vrot.slane %v311_v17, 1  ;;  %v397_v28 = vadd.f32 %v311_v17, %v306_v25  ;;  %v541_v17 = vld [vmem:[%s1675_s12 + $0x2] sm:$0x1] }
  0xbb   : > { %v313_v19 = vmul.f32 1.442695, %v312_v18  ;;  %v398_v26 = vadd.f32 %v394_v23, %v307_v24  ;;  %v405_v33 = vadd.f32 %v1738_v30, %v397_v28 }
  0xbd   : > { %1489 = vpow2.f32 %v313_v19  ;;  %v406_v31 = vadd.f32 %v1738_v30, %v398_v26 }
  0xc0   : > { %v420_v35 = vpop.permute.xlu0 %419 }
  0xc1   : > { %vm421_vm9 = vcmp.eq.s32.totalorder %v420_v35, 1 }
  0xc4   : > { %v643_v26 = vpop.permute.xlu0 %642 }
  0xc5   : > { %vm644_vm13 = vcmp.eq.s32.totalorder %v643_v26, 1 }
  0xca   : > { %v1490_v20 = vpop.eup %1489 }
  0xcb   : > { %1385 = vmatmul.mubr.msk.f32.vlgmr.msra.gmra.mxu0 %vm315_vm7, %v1490_v20 }
  0xcc   : > { %1395 = vmatpush3.msk.msra.mxu0 %vm319_vm3, %v1685_v8  ;;  %1398 = vmatprep.mubr.msk.f32.mxu0 %vm1595_vm4, %v1594_v9 }
  0xcd   : > { %1396 = vmatprep.subr.mxu0 %v1594_v9 }
  0xce   : > { %1397 = vmatpush3.msra.mxu0 %v1691_v10 }
  0xcf   : > { %1408 = vmatprep.subr.mxu0 %v1594_v9 }
 0x18b   : > { %v389_v21 = vpop.f32.mrf.mxu0 }
 0x18c   : > { %1491 = vlog2.f32 %v389_v21 }
 0x18d   : > { %v1386_v22 = vpop.f32.mrf.mxu0 }
 0x199   : > { %v1492_v27 = vpop.eup %1491 }
 0x19a   : > { %v408_v29 = vmul.f32 0.6931472, %v1492_v27 }
 0x19c   : > { %v410_v32 = vrot.slane %v408_v29, 1  ;;  %v413_v36 = vadd.f32 %v408_v29, %v405_v33  ;;  %v860_v33 = vstv %s762_s7 }
 0x19d   : > { %vm861_vm14 = vcmp.gt.s32.totalorder %v1711_v11, %v860_v33 }
 0x19e   : > { %v414_v34 = vadd.f32 %v410_v32, %v406_v31 }
 0x1a0   : > { %v424_v37 = vrot.slane %v414_v34, 7  ;;  %v862_v34 = vsel %vm861_vm14, 1, %v1596_v12 }
 0x1a2   : > { %v426_v38 = vsel %vm425_vm8, %v424_v37, %v413_v36 }
 0x1a3   : > { %v428_v39 = vsel %vm421_vm9, %v426_v38, %v1678_v6 }
 0x1a4   : > { %v432_v40 = vsel %vm308_vm2, %v428_v39, -inf }
 0x1a5   : > { %433 = vmax.xlane.f32.xlu1 %v432_v40 }
 0x1b6   : > { %531 = vperm.xlu1 %1488, %v529_v42   ;;  %v653_v42 = vld [vmem:[%s1675_s12 + $0xb] sm:$0x1] }
 0x22e   : > { %v434_v43 = vpop.xlane.xlu1 %433 }
 0x22f   : > { %v435_v44 = vsub.f32 %v428_v39, %v434_v43  ;;  %v512_v49 = vrot.slane %v434_v43, 1  ;;  %v515_v54 = vadd.f32 %v434_v43, %v430_v51  ;;  %v652_v43 = vld [vmem:[%s1675_s12 + $0x3] sm:$0x1] }
 0x231   : > { %v436_v45 = vmul.f32 1.442695, %v435_v44  ;;  %v516_v52 = vadd.f32 %v512_v49, %v431_v50  ;;  %v517_v59 = vadd.f32 %v1738_v30, %v515_v54 }
 0x232   : > { %v532_v58 = vpop.permute.xlu1 %531 }
 0x233   : > { %1493 = vpow2.f32 %v436_v45  ;;  %v518_v56 = vadd.f32 %v1738_v30, %v516_v52  ;;  %vm533_vm11 = vcmp.eq.s32.totalorder %v532_v58, 1  ;;  %v971_v58 = vstv %s873_s8 }
 0x234   : > { %vm972_vm0 = vcmp.gt.s32.totalorder %v1711_v11, %v971_v58 }
 0x240   : > { %v1494_v46 = vpop.eup %1493 }
 0x241   : > { %1392 = vmatmul.mubr.msk.f32.vlgmr.msra.gmra.mxu1 %vm315_vm7, %v1494_v46 }
 0x242   : > { %1402 = vmatpush3.msk.msra.mxu1 %vm319_vm3, %v1685_v8  ;;  %1405 = vmatprep.mubr.msk.f32.mxu1 %vm1595_vm4, %v1594_v9 }
 0x243   : > { %1403 = vmatprep.subr.mxu1 %v1594_v9 }
 0x244   : > { %1404 = vmatpush3.msra.mxu1 %v1691_v10 }
 0x245   : > { %1415 = vmatprep.subr.mxu1 %v1594_v9 }
 0x301   : > { %v507_v47 = vpop.f32.mrf.mxu1 }
 0x302   : > { %1495 = vlog2.f32 %v507_v47 }
 0x303   : > { %v1393_v48 = vpop.f32.mrf.mxu1 }
 0x30f   : > { %v1496_v53 = vpop.eup %1495 }
 0x310   : > { %v520_v55 = vmul.f32 0.6931472, %v1496_v53 }
 0x312   : > { %v522_v57 = vrot.slane %v520_v55, 1  ;;  %v525_v61 = vadd.f32 %v520_v55, %v517_v59  ;;  %v973_v59 = vsel %vm972_vm0, 1, %v1596_v12 }
 0x314   : > { %v526_v60 = vadd.f32 %v522_v57, %v518_v56 }
 0x316   : > { %v536_v62 = vrot.slane %v526_v60, 7 }
 0x318   : > { %v537_v63 = vsel %vm425_vm8, %v536_v62, %v525_v61 }
 0x319   : > { %v539_v0 = vsel %vm533_vm11, %v537_v63, %v428_v39 }
 0x31a   : > { %v543_v1 = vsel %vm308_vm2, %v539_v0, -inf }
 0x31b   : > { %544 = vmax.xlane.f32.xlu1 %v543_v1 }
 0x32c   : > { %753 = vperm.xlu1 %1488, %v751_v3   ;;  %v764_v3 = vld [vmem:[%s1675_s12 + $0xc] sm:$0x1] }
 0x3a4   : > { %v545_v4 = vpop.xlane.xlu1 %544 }
 0x3a5   : > { %v546_v5 = vsub.f32 %v539_v0, %v545_v4  ;;  %v623_v15 = vrot.slane %v545_v4, 1  ;;  %v626_v20 = vadd.f32 %v545_v4, %v541_v17  ;;  %v763_v4 = vld [vmem:[%s1675_s12 + $0x4] sm:$0x1] }
 0x3a7   : > { %v547_v6 = vmul.f32 1.442695, %v546_v5  ;;  %v627_v18 = vadd.f32 %v623_v15, %v542_v16  ;;  %v628_v24 = vadd.f32 %v1738_v30, %v626_v20 }
 0x3a8   : > { %v754_v52 = vpop.permute.xlu1 %753 }
 0x3a9   : > { %1497 = vpow2.f32 %v547_v6  ;;  %v629_v22 = vadd.f32 %v1738_v30, %v627_v18  ;;  %vm755_vm15 = vcmp.eq.s32.totalorder %v754_v52, 1 }
 0x3b6   : > { %v1498_v7 = vpop.eup %1497 }
 0x3b7   : > { %1399 = vmatmul.mubr.msk.f32.vlgmr.msra.gmra.mxu0 %vm315_vm7, %v1498_v7 }
 0x3b8   : > { %1409 = vmatpush3.msk.msra.mxu0 %vm319_vm3, %v1685_v8  ;;  %1412 = vmatprep.mubr.msk.f32.mxu0 %vm1595_vm4, %v1594_v9 }
 0x3b9   : > { %1410 = vmatprep.subr.mxu0 %v1594_v9 }
 0x3ba   : > { %1411 = vmatpush3.msra.mxu0 %v1691_v10 }
 0x3bb   : > { %1422 = vmatprep.subr.mxu0 %v1594_v9 }
 0x477   : > { %v618_v13 = vpop.f32.mrf.mxu0 }
 0x478   : > { %1499 = vlog2.f32 %v618_v13 }
 0x479   : > { %v1400_v14 = vpop.f32.mrf.mxu0 }
 0x485   : > { %v1500_v19 = vpop.eup %1499 }
 0x486   : > { %v631_v21 = vmul.f32 0.6931472, %v1500_v19 }
 0x488   : > { %v633_v23 = vrot.slane %v631_v21, 1  ;;  %v636_v27 = vadd.f32 %v631_v21, %v628_v24  ;;  %v1082_v24 = vstv %s984_s9 }
 0x489   : > { %vm1083_vm5 = vcmp.gt.s32.totalorder %v1711_v11, %v1082_v24 }
 0x48a   : > { %v637_v25 = vadd.f32 %v633_v23, %v629_v22 }
 0x48c   : > { %v647_v28 = vrot.slane %v637_v25, 7  ;;  %v1084_v25 = vsel %vm1083_vm5, 1, %v1596_v12 }
 0x48e   : > { %v648_v29 = vsel %vm425_vm8, %v647_v28, %v636_v27 }
 0x48f   : > { %v650_v31 = vsel %vm644_vm13, %v648_v29, %v539_v0 }
 0x490   : > { %v654_v32 = vsel %vm308_vm2, %v650_v31, -inf }
 0x491   : > { %655 = vmax.xlane.f32.xlu0 %v654_v32 }
 0x4a7   : > { %864 = vperm.xlu0 %1487, %v862_v34   ;;  %v875_v34 = vld [vmem:[%s1675_s12 + $0xd] sm:$0x1] }
 0x51a   : > { %v656_v35 = vpop.xlane.xlu0 %655 }
 0x51b   : > { %v657_v36 = vsub.f32 %v650_v31, %v656_v35  ;;  %v734_v41 = vrot.slane %v656_v35, 1  ;;  %v737_v46 = vadd.f32 %v656_v35, %v652_v43  ;;  %v874_v35 = vld [vmem:[%s1675_s12 + $0x5] sm:$0x1] }
 0x51d   : > { %v658_v37 = vmul.f32 1.442695, %v657_v36  ;;  %v738_v44 = vadd.f32 %v734_v41, %v653_v42  ;;  %v739_v50 = vadd.f32 %v1738_v30, %v737_v46 }
 0x51f   : > { %1501 = vpow2.f32 %v658_v37  ;;  %v740_v48 = vadd.f32 %v1738_v30, %v738_v44 }
 0x522   : > { %v865_v18 = vpop.permute.xlu0 %864 }
 0x523   : > { %vm866_vm1 = vcmp.eq.s32.totalorder %v865_v18, 1  ;;  %v1097_v18 = vld [vmem:[%s1675_s12 + $0xf] sm:$0x1] }
 0x52c   : > { %v1502_v38 = vpop.eup %1501 }
 0x52d   : > { %1406 = vmatmul.mubr.msk.f32.vlgmr.msra.gmra.mxu1 %vm315_vm7, %v1502_v38 }
 0x52e   : > { %1416 = vmatpush3.msk.msra.mxu1 %vm319_vm3, %v1685_v8  ;;  %1419 = vmatprep.mubr.msk.f32.mxu1 %vm1595_vm4, %v1594_v9 }
 0x52f   : > { %1417 = vmatprep.subr.mxu1 %v1594_v9 }
 0x530   : > { %1418 = vmatpush3.msra.mxu1 %v1691_v10 }
 0x531   : > { %1429 = vmatprep.subr.mxu1 %v1594_v9 }
 0x5ed   : > { %v729_v39 = vpop.f32.mrf.mxu1 }
 0x5ee   : > { %1503 = vlog2.f32 %v729_v39 }
 0x5ef   : > { %v1407_v40 = vpop.f32.mrf.mxu1 }
 0x5fb   : > { %v1504_v45 = vpop.eup %1503 }
 0x5fc   : > { %v742_v47 = vmul.f32 0.6931472, %v1504_v45 }
 0x5fe   : > { %v744_v49 = vrot.slane %v742_v47, 1  ;;  %v747_v53 = vadd.f32 %v742_v47, %v739_v50  ;;  %v1193_v47 = vstv %s1095_s10 }
 0x600   : > { %v748_v51 = vadd.f32 %v744_v49, %v740_v48 }
 0x602   : > { %v758_v54 = vrot.slane %v748_v51, 7 }
 0x604   : > { %v759_v55 = vsel %vm425_vm8, %v758_v54, %v747_v53 }
 0x605   : > { %v761_v56 = vsel %vm755_vm15, %v759_v55, %v650_v31 }
 0x606   : > { %v765_v57 = vsel %vm308_vm2, %v761_v56, -inf }
 0x607   : > { %766 = vmax.xlane.f32.xlu1 %v765_v57  ;;  %v985_v57 = vld [vmem:[%s1675_s12 + $0x6] sm:$0x1] }
 0x618   : > { %975 = vperm.xlu1 %1488, %v973_v59  }
 0x690   : > { %v767_v60 = vpop.xlane.xlu1 %766 }
 0x691   : > { %v768_v61 = vsub.f32 %v761_v56, %v767_v60  ;;  %v845_v2 = vrot.slane %v767_v60, 1  ;;  %v848_v7 = vadd.f32 %v767_v60, %v763_v4 }
 0x693   : > { %v769_v62 = vmul.f32 1.442695, %v768_v61  ;;  %v849_v5 = vadd.f32 %v845_v2, %v764_v3  ;;  %v850_v16 = vadd.f32 %v1738_v30, %v848_v7 }
 0x695   : > { %1505 = vpow2.f32 %v769_v62  ;;  %v851_v14 = vadd.f32 %v1738_v30, %v849_v5 }
 0x6a2   : > { %v1506_v63 = vpop.eup %1505 }
 0x6a3   : > { %1413 = vmatmul.mubr.msk.f32.vlgmr.msra.gmra.mxu0 %vm315_vm7, %v1506_v63 }
 0x6a4   : > { %1423 = vmatpush3.msk.msra.mxu0 %vm319_vm3, %v1685_v8  ;;  %1426 = vmatprep.mubr.msk.f32.mxu0 %vm1595_vm4, %v1594_v9 }
 0x6a5   : > { %1424 = vmatprep.subr.mxu0 %v1594_v9 }
 0x6a6   : > { %1425 = vmatpush3.msra.mxu0 %v1691_v10 }
 0x763   : > { %v840_v0 = vpop.f32.mrf.mxu0 }
 0x764   : > { %1507 = vlog2.f32 %v840_v0 }
 0x765   : > { %v1414_v1 = vpop.f32.mrf.mxu0 }
 0x771   : > { %v1508_v6 = vpop.eup %1507 }
 0x772   : > { %v853_v13 = vmul.f32 0.6931472, %v1508_v6 }
 0x774   : > { %v855_v15 = vrot.slane %v853_v13, 1  ;;  %v858_v19 = vadd.f32 %v853_v13, %v850_v16 }
 0x776   : > { %v859_v17 = vadd.f32 %v855_v15, %v851_v14 }
 0x778   : > { %v869_v20 = vrot.slane %v859_v17, 7 }
 0x77a   : > { %v870_v21 = vsel %vm425_vm8, %v869_v20, %v858_v19  ;;  %v1096_v19 = vld [vmem:[%s1675_s12 + $0x7] sm:$0x1] }
 0x77b   : > { %v872_v22 = vsel %vm866_vm1, %v870_v21, %v761_v56  ;;  %v986_v56 = vld [vmem:[%s1675_s12 + $0xe] sm:$0x1] }
 0x77c   : > { %v876_v23 = vsel %vm308_vm2, %v872_v22, -inf }
 0x77d   : > { %877 = vmax.xlane.f32.xlu0 %v876_v23 }
 0x793   : > { %1086 = vperm.xlu0 %1487, %v1084_v25  }
 0x806   : > { %v878_v26 = vpop.xlane.xlu0 %877 }
 0x807   : > { %v879_v27 = vsub.f32 %v872_v22, %v878_v26  ;;  %v956_v33 = vrot.slane %v878_v26, 1  ;;  %v959_v38 = vadd.f32 %v878_v26, %v874_v35 }
 0x809   : > { %v880_v28 = vmul.f32 1.442695, %v879_v27  ;;  %v960_v36 = vadd.f32 %v956_v33, %v875_v34  ;;  %v961_v41 = vadd.f32 %v1738_v30, %v959_v38 }
 0x80b   : > { %1509 = vpow2.f32 %v880_v28 }
 0x80e   : > { %v1087_v0 = vpop.permute.xlu0 %1086 }
 0x80f   : > { %vm1088_vm6 = vcmp.eq.s32.totalorder %v1087_v0, 1 }
 0x818   : > { %v1510_v29 = vpop.eup %1509 }
 0x819   : > { %1420 = vmatmul.mubr.msk.f32.vlgmr.msra.gmra.mxu1 %vm315_vm7, %v1510_v29 }
 0x81a   : > { %1430 = vmatpush3.msk.msra.mxu1 %vm319_vm3, %v1685_v8  ;;  %1433 = vmatprep.mubr.msk.f32.mxu1 %vm1595_vm4, %v1594_v9  ;;  %v962_v8 = vadd.f32 %v1738_v30, %v960_v36  ;;  %vm1194_vm4 = vcmp.gt.s32.totalorder %v1711_v11, %v1193_v47 }
 0x81b   : > { %1431 = vmatprep.subr.mxu1 %v1594_v9  ;;  %v976_v9 = vpop.permute.xlu1 %975  ;;  %v1195_v48 = vsel %vm1194_vm4, 1, %v1596_v12 }
 0x81c   : > { %1432 = vmatpush3.msra.mxu1 %v1691_v10  ;;  %vm977_vm3 = vcmp.eq.s32.totalorder %v976_v9, 1 }
 0x8d9   : > { %v951_v31 = vpop.f32.mrf.mxu1 }
 0x8da   : > { %1511 = vlog2.f32 %v951_v31 }
 0x8db   : > { %v1421_v32 = vpop.f32.mrf.mxu1 }
 0x8e7   : > { %v1512_v37 = vpop.eup %1511 }
 0x8e8   : > { %v964_v39 = vmul.f32 0.6931472, %v1512_v37 }
 0x8ea   : > { %v966_v40 = vrot.slane %v964_v39, 1  ;;  %v969_v43 = vadd.f32 %v964_v39, %v961_v41 }
 0x8ec   : > { %v970_v42 = vadd.f32 %v966_v40, %v962_v8 }
 0x8ee   : > { %v980_v10 = vrot.slane %v970_v42, 7 }
 0x8f0   : > { %v981_v44 = vsel %vm425_vm8, %v980_v10, %v969_v43 }
 0x8f1   : > { %v983_v45 = vsel %vm977_vm3, %v981_v44, %v872_v22 }
 0x8f2   : > { %v987_v46 = vsel %vm308_vm2, %v983_v45, -inf }
 0x8f3   : > { %988 = vmax.xlane.f32.xlu1 %v987_v46 }
 0x904   : > { %1197 = vperm.xlu1 %1488, %v1195_v48  }
 0x97c   : > { %v989_v49 = vpop.xlane.xlu1 %988 }
 0x97d   : > { %v990_v50 = vsub.f32 %v983_v45, %v989_v49  ;;  %v1067_v55 = vrot.slane %v989_v49, 1  ;;  %v1070_v60 = vadd.f32 %v989_v49, %v985_v57 }
 0x97f   : > { %v991_v51 = vmul.f32 1.442695, %v990_v50  ;;  %v1071_v58 = vadd.f32 %v1067_v55, %v986_v56  ;;  %v1072_v62 = vadd.f32 %v1738_v30, %v1070_v60 }
 0x980   : > { %v1198_v28 = vpop.permute.xlu1 %1197 }
 0x981   : > { %1513 = vpow2.f32 %v991_v51  ;;  %v1073_v12 = vadd.f32 %v1738_v30, %v1071_v58 }
 0x98e   : > { %v1514_v52 = vpop.eup %1513 }
 0x98f   : > { %1427 = vmatmul.mubr.msk.f32.vlgmr.msra.gmra.mxu0 %vm315_vm7, %v1514_v52 }
 0xa4f   : > { %v1062_v53 = vpop.f32.mrf.mxu0 }
 0xa50   : > { %1515 = vlog2.f32 %v1062_v53 }
 0xa51   : > { %v1428_v54 = vpop.f32.mrf.mxu0 }
 0xa5d   : > { %v1516_v59 = vpop.eup %1515 }
 0xa5e   : > { %v1075_v11 = vmul.f32 0.6931472, %v1516_v59 }
 0xa60   : > { %v1077_v61 = vrot.slane %v1075_v11, 1  ;;  %v1080_v1 = vadd.f32 %v1075_v11, %v1072_v62 }
 0xa62   : > { %v1081_v63 = vadd.f32 %v1077_v61, %v1073_v12 }
 0xa64   : > { %v1091_v2 = vrot.slane %v1081_v63, 7 }
 0xa66   : > { %v1092_v3 = vsel %vm425_vm8, %v1091_v2, %v1080_v1 }
 0xa67   : > { %v1094_v4 = vsel %vm1088_vm6, %v1092_v3, %v983_v45 }
 0xa68   : > { %v1098_v5 = vsel %vm308_vm2, %v1094_v4, -inf }
 0xa69   : > { %1099 = vmax.xlane.f32.xlu0 %v1098_v5 }
 0xaf2   : > { %v1100_v6 = vpop.xlane.xlu0 %1099 }
 0xaf3   : > { %v1101_v7 = vsub.f32 %v1094_v4, %v1100_v6  ;;  %v1178_v17 = vrot.slane %v1100_v6, 1  ;;  %v1181_v22 = vadd.f32 %v1100_v6, %v1096_v19 }
 0xaf5   : > { %v1102_v13 = vmul.f32 1.442695, %v1101_v7  ;;  %v1182_v20 = vadd.f32 %v1178_v17, %v1097_v18  ;;  %v1183_v26 = vadd.f32 %v1738_v30, %v1181_v22 }
 0xaf7   : > { %1517 = vpow2.f32 %v1102_v13  ;;  %v1184_v24 = vadd.f32 %v1738_v30, %v1182_v20 }
 0xb04   : > { %v1518_v14 = vpop.eup %1517 }
 0xb05   : > { %1434 = vmatmul.mubr.msk.f32.vlgmr.msra.gmra.mxu1 %vm315_vm7, %v1518_v14  ;;  %vm1199_vm7 = vcmp.eq.s32.totalorder %v1198_v28, 1 }
 0xbc5   : > { %v1173_v15 = vpop.f32.mrf.mxu1 }
 0xbc6   : > { %1519 = vlog2.f32 %v1173_v15 }
 0xbc7   : > { %v1435_v16 = vpop.f32.mrf.mxu1 }
 0xbd3   : > { %v1520_v21 = vpop.eup %1519 }
 0xbd4   : > { %v1186_v23 = vmul.f32 0.6931472, %v1520_v21 }
 0xbd6   : > { %v1188_v25 = vrot.slane %v1186_v23, 1  ;;  %v1191_v29 = vadd.f32 %v1186_v23, %v1183_v26 }
 0xbd8   : > { %v1192_v27 = vadd.f32 %v1188_v25, %v1184_v24 }
 0xbda   : > { %v1202_v31 = vrot.slane %v1192_v27, 7  ;;  %1210 = sbr.rel (%p1350_p10) target bundleno = 3359 (0xd1f), region = 86 }
 0xbdc   : > { %v1203_v32 = vsel %vm425_vm8, %v1202_v31, %v1191_v29 }
 0xbdd   : > { %v1205_v33 = vsel %vm1199_vm7, %v1203_v32, %v1094_v4 }
 0xbde   : > { %1206 = vst.msk [vmem:[#allocation2] sm:$0x3] %vm308_vm2, %v1205_v33 }
 0xbdf   : > { %v1351_v34 = vld [vmem:[%s1886_s3] ss:$0 sm:$0xff]  ;;  %v1232_v41 = vlaneseq  ;;  %vm1239_vm8 = vcmask 8192  }
 0xbe0   : > { %v1218_v35 = vadd.f32 %v1351_v34, %v1205_v33 }
 0xbe1   : > { %v1233_v42 = vand.u32 127, %v1232_v41  ;;  %v1235_v9 = vshrl.u32 %v1232_v41, 7 }
 0xbe2   : > { %v1219_v30 = vsel %vm308_vm2, %v1218_v35, -inf }
 0xbe3   : > { %1220 = vmax.xlane.f32.xlu0 %v1219_v30  ;;  %v1236_v10 = vsub.s32 %v1233_v42, %v1235_v9 }
 0xc6c   : > { %v1221_v36 = vpop.xlane.xlu0 %1220 }
 0xc6d   : > { %v1222_v37 = vsub.f32 %v1218_v35, %v1221_v36 }
 0xc6f   : > { %v1223_v38 = vmul.f32 1.442695, %v1222_v37 }
 0xc71   : > { %1521 = vpow2.f32 %v1223_v38 }
 0xc7e   : > { %v1522_v39 = vpop.eup %1521 }
 0xc7f   : > { %v1225_v8 = vsel %vm308_vm2, %v1522_v39, 0.0 }
 0xc80   : > { %1226 = vadd.xlane.f32.xlu0 %v1225_v8 }
 0xd09   : > { %v1227_v40 = vpop.xlane.xlu0 %1226 }
 0xd0a   : > { %1523 = vlog2.f32 %v1227_v40 }
 0xd17   : > { %v1524_v43 = vpop.eup %1523 }
 0xd18   : > { %v1229_v44 = vmul.f32 0.6931472, %v1524_v43 }
 0xd1a   : > { %v1230_v45 = vadd.f32 %v1229_v44, %v1221_v36 }
 0xd1c   : > { %v1237_v46 = vrot.slane %v1230_v45, %v1236_v10 }
 0xd1e   : > { %1240 = vst.msk [vmem:[#allocation4] sm:$0x1] %vm1239_vm8, %v1237_v46 }
 0xd1f PF: > { %p1853_p11 = scmp.eq.s32.totalorder %s1323_s23, 1  ;;  %s1597_s13 = smov [#allocation4]  }
 0xd20   : > { %s1250_s14 = sshll.u32 %s1597_s13, 4  ;;  %s1251_s14 = int_to_ptr.vmem [resolvable:$true] %s1250_s14 }
 0xd21   : > { %s1525_s15 = scalar_lea.vmem %s1251_s14, 16  ;;  %s1531_s16 = scalar_lea.vmem %s1251_s14, 32 }
 0xd22   : > { %p1526_p12 = scmp.ne.s32.totalorder %s1251_s14, %s1525_s15  ;;  %p1532_p1 = scmp.lt.s32.totalorder %s1251_s14, %s1251_s14 }
 0xd23   : > { %p1533_p2 = scmp.lt.s32.totalorder %s1531_s16, %s1525_s15 }
 0xd24   : > { %p1527_p13 = pnand %p1526_p12, %p1853_p11 }
 0xd25   : > { %p1534_p3 = por %p1533_p2, %p1532_p1 }
 0xd26   : > { %p1528_p0 = pneg %p1527_p13 }
 0xd28   : > { %p1535_p4 = pnand %p1534_p3, %p1528_p0 }
 0xd2a   : > { %1538 = shalt.err (!%p1535_p4)
}
 0xd2b   : > { %1437 = dma.vmem_to_hbm [thread:$0]  (%p1853_p11), %s1251_s14, 16, %s1888_s5, [#allocation5]  }
 0xd2c   : > { %1570 = dma.done.wait (%p1853_p11), [#allocation5], 16  }
 0xd2d   : > { %1572 = vsyncadd (%p1853_p11), [#allocation5], 4294967280 }
 0xd2e PF: > { %s16_s22 = sadd.s32 1, %s1591_s22   ;;  %s1890_s18 = smov %s1579_s19 }
 0xd2f   : > { %p13_p5 = scmp.ge.s32.totalorder %s16_s22, 4   ;;  %s1891_s19 = smov %s1664_s27 }
 0xd30   : > { %s1892_s20 = smov %s1587_s21  ;;  %s1893_s21 = smov %s1895_s24 }
 0xd31   :  { %15 = sbr.rel (!%p13_p5) target bundleno = 3 (0x3), region = 122 }
 0xd36   :  { %1263 = vsyncpa [#allocation5], 1 }
 0xd37   :  { %1265 = vsyncpa [#allocation5 + $0x1], 1 }

</bundles_post_ra>
